<compile_context>
chip_gen: v6e
topology: v6e:2x2x1
jax: 0.10.0
libtpu: 0.0.40
codegen_flags: <defaults>
</compile_context>

<pallas_src>
import jax
import jax.numpy as jnp
from jax.experimental import pallas as pl
from jax.experimental.pallas import tpu as pltpu


def mlp_kernel(x_ref, wa_ref, wb_ref, vec_ref, out_ref):
    # x_ref:   (TB, 16)  batch tile (batch on sublanes; transposed in-kernel)
    # wa_ref:  (40, 16)  rows 0:32 = W0, row 32 = w3, rows 33:40 = 0
    # wb_ref:  (16, 32)  W1
    # vec_ref: (120, 1)  packed column vectors + scalar tail (see pack_params)
    # out_ref: (1, TB)   lane-dense output row
    xt = x_ref[...].T                                    # (16, TB)

    b0 = vec_ref[0:32, :]                                # (32, 1)
    b1 = vec_ref[32:48, :]                               # (16, 1)
    w2 = vec_ref[48:64, :]                               # (16, 1)
    w4 = vec_ref[64:80, :]                               # (16, 1)
    b4 = vec_ref[80:96, :]                               # (16, 1)
    w5 = vec_ref[96:112, :]                              # (16, 1)
    tail = vec_ref[112:120, :]                           # (8, 1) = [b2,b3,b5,0,...]
    b2 = tail[0:1, :]                                    # (1, 1)
    b3 = tail[1:2, :]
    b5 = tail[2:3, :]

    # Fused first MXU pass: [W0; w3; 0] @ x^T -> (40, TB)
    t = jnp.dot(wa_ref[...], xt, preferred_element_type=jnp.float32)
    h_pre = t[0:32, :]                                   # W0 @ x^T   (32, TB)
    x1_pre = t[32:33, :]                                 # w3 @ x^T   (1, TB)

    # linear_0 + sigmoid
    h = jax.nn.sigmoid(h_pre + b0)                       # (32, TB)

    # linear_1 + relu
    h = jnp.dot(wb_ref[...], h, preferred_element_type=jnp.float32) + b1
    h = jnp.maximum(h, 0.0)                              # (16, TB)

    # linear_2 (16 -> 1): sublane reduction
    xb = jnp.sum(w2 * h, axis=0, keepdims=True) + b2     # (1, TB)

    # linear_3 + relu (matmul already done in the fused first pass)
    x1 = jnp.maximum(x1_pre + b3, 0.0)                   # (1, TB)

    goal = xb + x1                                       # (1, TB)

    # judge_0 (1 -> 16): broadcast outer product + relu
    g = jnp.maximum(w4 * goal + b4, 0.0)                 # (16, TB)

    # judge_1 (16 -> 1): sublane reduction
    g = jnp.sum(w5 * g, axis=0, keepdims=True) + b5      # (1, TB)

    out_ref[...] = jax.nn.sigmoid(g)                     # (1, TB)


def init_linear(key, out_features, in_features):
    """Deterministic PyTorch-style uniform(-1/sqrt(fan_in), 1/sqrt(fan_in)) init."""
    kw, kb = jax.random.split(key)
    bound = 1.0 / jnp.sqrt(jnp.float32(in_features))
    w = jax.random.uniform(kw, (out_features, in_features), jnp.float32,
                           minval=-bound, maxval=bound)
    b = jax.random.uniform(kb, (out_features,), jnp.float32,
                           minval=-bound, maxval=bound)
    return w, b


def make_params(key):
    keys = jax.random.split(key, 6)
    w0, b0 = init_linear(keys[0], 32, 16)   # linear_0
    w1, b1 = init_linear(keys[1], 16, 32)   # linear_1
    w2, b2 = init_linear(keys[2], 1, 16)    # linear_2
    w3, b3 = init_linear(keys[3], 1, 16)    # linear_3
    w4, b4 = init_linear(keys[4], 16, 1)    # judge_0
    w5, b5 = init_linear(keys[5], 1, 16)    # judge_1
    return dict(w0=w0, b0=b0, w1=w1, b1=b1, w2=w2, b2=b2,
                w3=w3, b3=b3, w4=w4, b4=b4, w5=w5, b5=b5)


def pack_params(p):
    """One-time parameter packing (hoisted out of the per-step path)."""
    f32 = jnp.float32

    # First-pass MXU slab (40, 16): rows 0:32 = W0, row 32 = w3, rows 33:40 = 0.
    wa = jnp.concatenate([p["w0"].astype(f32),
                          p["w3"].reshape(1, 16).astype(f32),
                          jnp.zeros((7, 16), f32)], axis=0)

    # Second-pass MXU slab (16, 32): W1 as-is (no transpose needed in-kernel).
    wb = p["w1"].astype(f32)

    def col(v, rows=16):
        v = jnp.reshape(v, (-1,)).astype(f32)
        return jnp.pad(v, (0, rows - v.shape[0])).reshape(rows, 1)

    # Packed column-vector slab (120, 1); every row offset is 8-aligned.
    vec = jnp.concatenate([
        col(p["b0"], 32),                                   # rows   0:32  linear_0 bias
        col(p["b1"]),                                        # rows  32:48  linear_1 bias
        col(p["w2"]),                                        # rows  48:64  linear_2 weight
        col(p["w4"]),                                        # rows  64:80  judge_0 weight
        col(p["b4"]),                                        # rows  80:96  judge_0 bias
        col(p["w5"]),                                        # rows  96:112 judge_1 weight
        col(jnp.concatenate([p["b2"], p["b3"], p["b5"]]), 8),  # rows 112:120 [b2,b3,b5,0..]
    ], axis=0)

    return dict(wa=wa, wb=wb, vec=vec)


def _batch_tiling(batch):
    """Lane-block (multiple of 128, <=512) and padded batch size."""
    if batch <= 512:
        tb = ((batch + 127) // 128) * 128
    else:
        tb = 512
    b_pad = ((batch + tb - 1) // tb) * tb
    return tb, b_pad


@jax.jit
def train_model_forward(x, packed):
    b = x.shape[0]
    tb, b_pad = _batch_tiling(b)
    xp = x.astype(jnp.float32)
    if b_pad != b:
        xp = jnp.pad(xp, ((0, b_pad - b), (0, 0)))

    out_row = pl.pallas_call(
        mlp_kernel,
        out_shape=jax.ShapeDtypeStruct((1, b_pad), jnp.float32),
        grid=(b_pad // tb,),
        in_specs=[
            pl.BlockSpec((tb, 16), lambda i: (i, 0)),     # x batch tile
            pl.BlockSpec((40, 16), lambda i: (0, 0)),     # [W0; w3; 0] (resident)
            pl.BlockSpec((16, 32), lambda i: (0, 0)),     # W1 (resident)
            pl.BlockSpec((120, 1), lambda i: (0, 0)),     # packed vectors (resident)
        ],
        out_specs=pl.BlockSpec((1, tb), lambda i: (0, i)),
        compiler_params=pltpu.CompilerParams(
            dimension_semantics=("parallel",)),
    )(xp, packed["wa"], packed["wb"], packed["vec"])

    return out_row[0, :b].reshape(b, 1)


def reference_forward(x, p):
    """Pure-JAX reference mirroring the PyTorch forward."""
    x0 = x
    h = jax.nn.sigmoid(x @ p["w0"].T + p["b0"])
    h = jnp.maximum(h @ p["w1"].T + p["b1"], 0.0)
    xb = h @ p["w2"].T + p["b2"]
    x1 = jnp.maximum(x0 @ p["w3"].T + p["b3"], 0.0)
    goal = xb + x1
    g = jnp.maximum(goal @ p["w4"].T + p["b4"], 0.0)
    g = g @ p["w5"].T + p["b5"]
    return jax.nn.sigmoid(g)


if __name__ == "__main__":
    key = jax.random.PRNGKey(0)
    kx, kp = jax.random.split(key)
    x = jax.random.normal(kx, (64, 16), jnp.float32)
    params = make_params(kp)
    packed = pack_params(params)          # one-time packing, off the hot path

    out = jax.block_until_ready(train_model_forward(x, packed))
    ref = reference_forward(x, params)

    assert out.shape == (64, 1)
    # Tolerance covers the reordered f32 summation inside the kernel.
    assert jnp.allclose(out, ref, atol=1e-4, rtol=1e-4), "mismatch vs reference"
    print("KERNEL_OK")
</pallas_src>

<mosaic_0001>
module attributes {stable_mosaic.version = 11 : i64} {
  func.func @mlp_kernel(%arg0: i32, %arg1: memref<128x16xf32, #tpu.memory_space<vmem>>, %arg2: memref<40x16xf32, #tpu.memory_space<vmem>>, %arg3: memref<16x32xf32, #tpu.memory_space<vmem>>, %arg4: memref<120x1xf32, #tpu.memory_space<vmem>>, %arg5: memref<1x128xf32, #tpu.memory_space<vmem>>) attributes {dimension_semantics = [#tpu.dimension_semantics<parallel>], iteration_bounds = array<i64: 1>, scalar_prefetch = 0 : i64, scratch_operands = 0 : i64, tpu.core_type = #tpu.core_type<tc>, window_params = [{transform_indices = @transform_0, window_bounds = array<i64: 128, 16>}, {pipeline_mode = #tpu.pipeline_mode<synchronous>, transform_indices = @transform_1, window_bounds = array<i64: 40, 16>}, {pipeline_mode = #tpu.pipeline_mode<synchronous>, transform_indices = @transform_2, window_bounds = array<i64: 16, 32>}, {pipeline_mode = #tpu.pipeline_mode<synchronous>, transform_indices = @transform_3, window_bounds = array<i64: 120, 1>}, {transform_indices = @transform_4, window_bounds = array<i64: 1, 128>}]} {
    %c0 = arith.constant 0 : index
    %c0_0 = arith.constant 0 : index
    %0 = vector.load %arg1[%c0, %c0_0] : memref<128x16xf32, #tpu.memory_space<vmem>>, vector<128x16xf32>
    %1 = tpu.transpose %0, [1, 0] : vector<128x16xf32> -> vector<16x128xf32>
    %c0_1 = arith.constant 0 : index
    %c0_2 = arith.constant 0 : index
    %2 = vector.load %arg4[%c0_1, %c0_2] : memref<120x1xf32, #tpu.memory_space<vmem>>, vector<32x1xf32>
    %c32 = arith.constant 32 : index
    %c0_3 = arith.constant 0 : index
    %3 = vector.load %arg4[%c32, %c0_3] : memref<120x1xf32, #tpu.memory_space<vmem>>, vector<16x1xf32>
    %c48 = arith.constant 48 : index
    %c0_4 = arith.constant 0 : index
    %4 = vector.load %arg4[%c48, %c0_4] : memref<120x1xf32, #tpu.memory_space<vmem>>, vector<16x1xf32>
    %c64 = arith.constant 64 : index
    %c0_5 = arith.constant 0 : index
    %5 = vector.load %arg4[%c64, %c0_5] : memref<120x1xf32, #tpu.memory_space<vmem>>, vector<16x1xf32>
    %c80 = arith.constant 80 : index
    %c0_6 = arith.constant 0 : index
    %6 = vector.load %arg4[%c80, %c0_6] : memref<120x1xf32, #tpu.memory_space<vmem>>, vector<16x1xf32>
    %c96 = arith.constant 96 : index
    %c0_7 = arith.constant 0 : index
    %7 = vector.load %arg4[%c96, %c0_7] : memref<120x1xf32, #tpu.memory_space<vmem>>, vector<16x1xf32>
    %c112 = arith.constant 112 : index
    %c0_8 = arith.constant 0 : index
    %8 = vector.load %arg4[%c112, %c0_8] : memref<120x1xf32, #tpu.memory_space<vmem>>, vector<8x1xf32>
    %9 = vector.extract_strided_slice %8 {offsets = [0, 0], sizes = [1, 1], strides = [1, 1]} : vector<8x1xf32> to vector<1x1xf32>
    %10 = vector.extract_strided_slice %8 {offsets = [1, 0], sizes = [1, 1], strides = [1, 1]} : vector<8x1xf32> to vector<1x1xf32>
    %11 = vector.extract_strided_slice %8 {offsets = [2, 0], sizes = [1, 1], strides = [1, 1]} : vector<8x1xf32> to vector<1x1xf32>
    %c0_9 = arith.constant 0 : index
    %c0_10 = arith.constant 0 : index
    %12 = vector.load %arg2[%c0_9, %c0_10] : memref<40x16xf32, #tpu.memory_space<vmem>>, vector<40x16xf32>
    %cst = arith.constant dense<0.000000e+00> : vector<40x128xf32>
    %13 = tpu.matmul %12, %1, %cst {dimension_numbers = #tpu.dot_dimension_numbers<[1], [0], [0], [1], [0, 0, 1, 1], [], []>} : vector<40x16xf32>, vector<16x128xf32>, vector<40x128xf32> -> vector<40x128xf32>
    %14 = vector.extract_strided_slice %13 {offsets = [0, 0], sizes = [32, 128], strides = [1, 1]} : vector<40x128xf32> to vector<32x128xf32>
    %15 = vector.extract_strided_slice %13 {offsets = [32, 0], sizes = [1, 128], strides = [1, 1]} : vector<40x128xf32> to vector<1x128xf32>
    %16 = vector.broadcast %2 : vector<32x1xf32> to vector<32x128xf32>
    %17 = arith.addf %14, %16 : vector<32x128xf32>
    %18 = arith.negf %17 : vector<32x128xf32>
    %19 = math.exp %18 : vector<32x128xf32>
    %cst_11 = arith.constant 1.000000e+00 : f32
    %20 = vector.broadcast %cst_11 : f32 to vector<32x128xf32>
    %21 = arith.addf %20, %19 : vector<32x128xf32>
    %22 = arith.divf %20, %21 : vector<32x128xf32>
    %c0_12 = arith.constant 0 : index
    %c0_13 = arith.constant 0 : index
    %23 = vector.load %arg3[%c0_12, %c0_13] : memref<16x32xf32, #tpu.memory_space<vmem>>, vector<16x32xf32>
    %cst_14 = arith.constant dense<0.000000e+00> : vector<16x128xf32>
    %24 = tpu.matmul %23, %22, %cst_14 {dimension_numbers = #tpu.dot_dimension_numbers<[1], [0], [0], [1], [0, 0, 1, 1], [], []>} : vector<16x32xf32>, vector<32x128xf32>, vector<16x128xf32> -> vector<16x128xf32>
    %25 = vector.broadcast %3 : vector<16x1xf32> to vector<16x128xf32>
    %26 = arith.addf %24, %25 : vector<16x128xf32>
    %cst_15 = arith.constant 0.000000e+00 : f32
    %27 = vector.broadcast %cst_15 : f32 to vector<16x128xf32>
    %28 = arith.maximumf %26, %27 : vector<16x128xf32>
    %29 = vector.broadcast %4 : vector<16x1xf32> to vector<16x128xf32>
    %30 = arith.mulf %29, %28 : vector<16x128xf32>
    %cst_16 = arith.constant dense<0.000000e+00> : vector<128xf32>
    %31 = vector.multi_reduction <add>, %30, %cst_16 [0] : vector<16x128xf32> to vector<128xf32>
    %32 = vector.shape_cast %31 : vector<128xf32> to vector<1x128xf32>
    %33 = vector.broadcast %9 : vector<1x1xf32> to vector<1x128xf32>
    %34 = arith.addf %32, %33 : vector<1x128xf32>
    %35 = vector.broadcast %10 : vector<1x1xf32> to vector<1x128xf32>
    %36 = arith.addf %15, %35 : vector<1x128xf32>
    %cst_17 = arith.constant 0.000000e+00 : f32
    %37 = vector.broadcast %cst_17 : f32 to vector<1x128xf32>
    %38 = arith.maximumf %36, %37 : vector<1x128xf32>
    %39 = arith.addf %34, %38 : vector<1x128xf32>
    %40 = vector.broadcast %5 : vector<16x1xf32> to vector<16x128xf32>
    %41 = vector.broadcast %39 : vector<1x128xf32> to vector<16x128xf32>
    %42 = arith.mulf %40, %41 : vector<16x128xf32>
    %43 = vector.broadcast %6 : vector<16x1xf32> to vector<16x128xf32>
    %44 = arith.addf %42, %43 : vector<16x128xf32>
    %cst_18 = arith.constant 0.000000e+00 : f32
    %45 = vector.broadcast %cst_18 : f32 to vector<16x128xf32>
    %46 = arith.maximumf %44, %45 : vector<16x128xf32>
    %47 = vector.broadcast %7 : vector<16x1xf32> to vector<16x128xf32>
    %48 = arith.mulf %47, %46 : vector<16x128xf32>
    %cst_19 = arith.constant dense<0.000000e+00> : vector<128xf32>
    %49 = vector.multi_reduction <add>, %48, %cst_19 [0] : vector<16x128xf32> to vector<128xf32>
    %50 = vector.shape_cast %49 : vector<128xf32> to vector<1x128xf32>
    %51 = vector.broadcast %11 : vector<1x1xf32> to vector<1x128xf32>
    %52 = arith.addf %50, %51 : vector<1x128xf32>
    %53 = arith.negf %52 : vector<1x128xf32>
    %54 = math.exp %53 : vector<1x128xf32>
    %cst_20 = arith.constant 1.000000e+00 : f32
    %55 = vector.broadcast %cst_20 : f32 to vector<1x128xf32>
    %56 = arith.addf %55, %54 : vector<1x128xf32>
    %57 = arith.divf %55, %56 : vector<1x128xf32>
    %c0_21 = arith.constant 0 : index
    %c0_22 = arith.constant 0 : index
    %58 = vector.load %arg5[%c0_21, %c0_22] : memref<1x128xf32, #tpu.memory_space<vmem>>, vector<1x128xf32>
    tpu.vector_store %arg5[%c0_21, %c0_22], %57 {strides = array<i32>} : memref<1x128xf32, #tpu.memory_space<vmem>>, vector<1x128xf32>,
    return
  }
  func.func @transform_0(%arg0: i32) -> (i32, i32) {
    %c0_i32 = arith.constant 0 : i32
    %c0_i32_0 = arith.constant 0 : i32
    return %arg0, %c0_i32 : i32, i32
  }
  func.func @transform_1(%arg0: i32) -> (i32, i32) {
    %c0_i32 = arith.constant 0 : i32
    %c0_i32_0 = arith.constant 0 : i32
    %c0_i32_1 = arith.constant 0 : i32
    return %c0_i32, %c0_i32_0 : i32, i32
  }
  func.func @transform_2(%arg0: i32) -> (i32, i32) {
    %c0_i32 = arith.constant 0 : i32
    %c0_i32_0 = arith.constant 0 : i32
    %c0_i32_1 = arith.constant 0 : i32
    return %c0_i32, %c0_i32_0 : i32, i32
  }
  func.func @transform_3(%arg0: i32) -> (i32, i32) {
    %c0_i32 = arith.constant 0 : i32
    %c0_i32_0 = arith.constant 0 : i32
    %c0_i32_1 = arith.constant 0 : i32
    return %c0_i32, %c0_i32_0 : i32, i32
  }
  func.func @transform_4(%arg0: i32) -> (i32, i32) {
    %c0_i32 = arith.constant 0 : i32
    %c0_i32_0 = arith.constant 0 : i32
    return %c0_i32, %arg0 : i32, i32
  }
}

</mosaic_0001>

<bundles_post_ra>
// kernel: train_model_forward.1
= control target key start
LH: loop header
LB: loop body
LE: loop exit
PB: predicated region body
PF: predicated region fallthrough
CT: control target
= control target key end

     0   :  { %vm53_vm0 = vcmask 130048   ;;  %v612_v0 = vmov 0.0   ;;  %vm613_vm1 = vmmov 0   ;;  %v614_v3 = vmov 0   ;;  %s838_s0 = inlined_call_operand.vmem [shape: f32[128,16], index: 0, kind: input, shape index: {}]   ;;  %s839_s3 = inlined_call_operand.vmem [shape: f32[120,1], index: 3, kind: input, shape index: {}]   ;;  %s840_s1 = inlined_call_operand.vmem [shape: f32[40,16], index: 1, kind: input, shape index: {}]   ;;  %s841_s2 = inlined_call_operand.vmem [shape: f32[16,32], index: 2, kind: input, shape index: {}]   ;;  %s842_s4 = inlined_call_operand.vmem [shape: f32[1,128], index: 4, kind: output, shape index: {}]  }
   0x1   :  { %497 = vmatprep.subr.mxu0 %v612_v0  ;;  %v32_v1 = vld [vmem:[%s838_s0 + $0x78] sm:$0xff]  ;;  %555 = vmatprep.subr.mxu1 %v612_v0  ;;  %v31_v2 = vld [vmem:[%s838_s0 + $0x70] sm:$0xff]  ;;  %v30_v4 = vld [vmem:[%s838_s0 + $0x68] sm:$0xff]  ;;  %vm267_vm2 = vcmask 261120  }
   0x2   :  { %498 = vmatpush3.xpose.msk.msra.mxu0 %vm53_vm0, %v32_v1  ;;  %571 = vmatpush3.xpose.msk.msra.mxu1 %vm53_vm0, %v32_v1  ;;  %v36_v5 = vld [vmem:[%s839_s3 + $0x18] sm:$0xff]  ;;  %v34_v6 = vld [vmem:[%s839_s3 + $0x8] sm:$0xff]  ;;  %v35_v7 = vld [vmem:[%s839_s3 + $0x10] sm:$0xff] }
   0x3   :  { %499 = vmatprep.subr.mxu0 %v612_v0  ;;  %556 = vmatprep.subr.mxu1 %v612_v0  ;;  %v29_v8 = vld [vmem:[%s838_s0 + $0x60] sm:$0xff]  ;;  %v28_v11 = vld [vmem:[%s838_s0 + $0x58] sm:$0xff]  ;;  %v38_v12 = vld [vmem:[%s839_s3 + $0x28] sm:$0xff] }
   0x4   :  { %529 = vmatprep.mubr.msk.f32.mxu0 %vm613_vm1, %v612_v0  ;;  %538 = vmatprep.mubr.msk.f32.mxu1 %vm613_vm1, %v612_v0  ;;  %v33_v9 = vld [vmem:[%s839_s3] sm:$0xff]  ;;  %v39_v13 = vld [vmem:[%s839_s3 + $0x30] sm:$0xff]  ;;  %v40_v15 = vld [vmem:[%s839_s3 + $0x38] sm:$0xff] }
   0x5   :  { %590 = vset.pattern.permute.xlu0 %v614_v3  ;;  %591 = vset.pattern.permute.xlu1 %v614_v3  ;;  %v37_v10 = vld [vmem:[%s839_s3 + $0x20] sm:$0xff]  ;;  %v27_v14 = vld [vmem:[%s838_s0 + $0x50] sm:$0xff]  ;;  %v26_v17 = vld [vmem:[%s838_s0 + $0x48] sm:$0xff] }
   0x6   :  { %500 = vmatpush3.xpose.msk.msra.mxu0 %vm53_vm0, %v31_v2  ;;  %572 = vmatpush3.xpose.msk.msra.mxu1 %vm53_vm0, %v31_v2  ;;  %v47_v16 = vld [vmem:[%s839_s3 + $0x70] sm:$0xff]  ;;  %v41_v18 = vld [vmem:[%s839_s3 + $0x40] sm:$0xff]  ;;  %v42_v19 = vld [vmem:[%s839_s3 + $0x48] sm:$0xff] }
   0x7   :  { %501 = vmatprep.subr.mxu0 %v612_v0  ;;  %557 = vmatprep.subr.mxu1 %v612_v0  ;;  %v25_v20 = vld [vmem:[%s838_s0 + $0x40] sm:$0xff]  ;;  %v43_v21 = vld [vmem:[%s839_s3 + $0x50] sm:$0xff]  ;;  %v44_v22 = vld [vmem:[%s839_s3 + $0x58] sm:$0xff] }
   0x8   :  { %224 = vperm.xlu0 %590, %v36_v5   ;;  %214 = vperm.xlu1 %591, %v34_v6   ;;  %v24_v23 = vld [vmem:[%s838_s0 + $0x38] sm:$0xff]  ;;  %v45_v24 = vld [vmem:[%s839_s3 + $0x60] sm:$0xff]  ;;  %v46_v25 = vld [vmem:[%s839_s3 + $0x68] sm:$0xff] }
   0x9   :  { %v23_v26 = vld [vmem:[%s838_s0 + $0x30] sm:$0xff]  ;;  %v22_v27 = vld [vmem:[%s838_s0 + $0x28] sm:$0xff]  ;;  %v21_v28 = vld [vmem:[%s838_s0 + $0x20] sm:$0xff] }
   0xa   :  { %502 = vmatpush3.xpose.msk.msra.mxu0 %vm53_vm0, %v30_v4  ;;  %573 = vmatpush3.xpose.msk.msra.mxu1 %vm53_vm0, %v30_v4  ;;  %v20_v29 = vld [vmem:[%s838_s0 + $0x18] sm:$0xff]  ;;  %v19_v30 = vld [vmem:[%s838_s0 + $0x10] sm:$0xff]  ;;  %v18_v31 = vld [vmem:[%s838_s0 + $0x8] sm:$0xff] }
   0xb   :  { %503 = vmatprep.subr.mxu0 %v612_v0  ;;  %558 = vmatprep.subr.mxu1 %v612_v0  ;;  %v17_v32 = vld [vmem:[%s838_s0] sm:$0xff]  ;;  %v51_v34 = vld [vmem:[%s840_s1 + $0x18] sm:$0xff]  ;;  %v49_v35 = vld [vmem:[%s840_s1 + $0x8] sm:$0xff] }
   0xc   :  { %219 = vperm.xlu0 %590, %v35_v7   ;;  %209 = vperm.xlu1 %591, %v33_v9   ;;  %v48_v33 = vld [vmem:[%s840_s1] sm:$0xff]  ;;  %v50_v37 = vld [vmem:[%s840_s1 + $0x10] sm:$0xff]  ;;  %v256_v9 = vld [vmem:[%s841_s2 + $0x8] sm:$0xff] }
   0xd   :  { %v52_v36 = vld [vmem:[%s840_s1 + $0x20] sm:$0xff] }
   0xe   :  { %504 = vmatpush3.xpose.msk.msra.mxu0 %vm53_vm0, %v29_v8  ;;  %574 = vmatpush3.xpose.msk.msra.mxu1 %vm53_vm0, %v29_v8  ;;  %v255_v38 = vld [vmem:[%s841_s2] sm:$0xff] }
   0xf   :  { %505 = vmatprep.subr.mxu0 %v612_v0  ;;  %559 = vmatprep.subr.mxu1 %v612_v0 }
  0x10   :  { %259 = vperm.xlu0 %590, %v37_v10   ;;  %264 = vperm.xlu1 %591, %v38_v12  }
  0x12   :  { %506 = vmatpush3.xpose.msk.msra.mxu0 %vm53_vm0, %v28_v11  ;;  %575 = vmatpush3.xpose.msk.msra.mxu1 %vm53_vm0, %v28_v11 }
  0x13   :  { %507 = vmatprep.subr.mxu0 %v612_v0  ;;  %560 = vmatprep.subr.mxu1 %v612_v0 }
  0x14   :  { %353 = vperm.xlu0 %590, %v39_v13   ;;  %358 = vperm.xlu1 %591, %v40_v15  }
  0x16   :  { %508 = vmatpush3.xpose.msk.msra.mxu0 %vm53_vm0, %v27_v14  ;;  %576 = vmatpush3.xpose.msk.msra.mxu1 %vm53_vm0, %v27_v14 }
  0x17   :  { %509 = vmatprep.subr.mxu0 %v612_v0  ;;  %561 = vmatprep.subr.mxu1 %v612_v0 }
  0x18   :  { %372 = vperm.xlu0 %590, %v47_v16   ;;  %383 = vperm.xlu1 %591, %v41_v18  }
  0x1a   :  { %510 = vmatpush3.xpose.msk.msra.mxu0 %vm53_vm0, %v26_v17  ;;  %577 = vmatpush3.xpose.msk.msra.mxu1 %vm53_vm0, %v26_v17 }
  0x1b   :  { %511 = vmatprep.subr.mxu0 %v612_v0  ;;  %562 = vmatprep.subr.mxu1 %v612_v0 }
  0x1c   :  { %388 = vperm.xlu0 %590, %v42_v19   ;;  %399 = vperm.xlu1 %591, %v43_v21  }
  0x1e   :  { %512 = vmatpush3.xpose.msk.msra.mxu0 %vm53_vm0, %v25_v20  ;;  %578 = vmatpush3.xpose.msk.msra.mxu1 %vm53_vm0, %v25_v20 }
  0x1f   :  { %513 = vmatprep.subr.mxu0 %v612_v0  ;;  %563 = vmatprep.subr.mxu1 %v612_v0 }
  0x20   :  { %404 = vperm.xlu0 %590, %v44_v22   ;;  %413 = vperm.xlu1 %591, %v45_v24  }
  0x22   :  { %514 = vmatpush3.xpose.msk.msra.mxu0 %vm53_vm0, %v24_v23  ;;  %579 = vmatpush3.xpose.msk.msra.mxu1 %vm53_vm0, %v24_v23 }
  0x23   :  { %515 = vmatprep.subr.mxu0 %v612_v0  ;;  %564 = vmatprep.subr.mxu1 %v612_v0 }
  0x24   :  { %418 = vperm.xlu0 %590, %v46_v25  }
  0x26   :  { %516 = vmatpush3.xpose.msk.msra.mxu0 %vm53_vm0, %v23_v26  ;;  %580 = vmatpush3.xpose.msk.msra.mxu1 %vm53_vm0, %v23_v26 }
  0x27   :  { %517 = vmatprep.subr.mxu0 %v612_v0  ;;  %565 = vmatprep.subr.mxu1 %v612_v0 }
  0x2a   :  { %518 = vmatpush3.xpose.msk.msra.mxu0 %vm53_vm0, %v22_v27  ;;  %581 = vmatpush3.xpose.msk.msra.mxu1 %vm53_vm0, %v22_v27 }
  0x2b   :  { %519 = vmatprep.subr.mxu0 %v612_v0  ;;  %566 = vmatprep.subr.mxu1 %v612_v0 }
  0x2e   :  { %520 = vmatpush3.xpose.msk.msra.mxu0 %vm53_vm0, %v21_v28  ;;  %582 = vmatpush3.xpose.msk.msra.mxu1 %vm53_vm0, %v21_v28  ;;  %v391_v28 = vlaneseq }
  0x2f   :  { %521 = vmatprep.subr.mxu0 %v612_v0  ;;  %567 = vmatprep.subr.mxu1 %v612_v0 }
  0x32   :  { %522 = vmatpush3.xpose.msk.msra.mxu0 %vm53_vm0, %v20_v29  ;;  %583 = vmatpush3.xpose.msk.msra.mxu1 %vm53_vm0, %v20_v29 }
  0x33   :  { %523 = vmatprep.subr.mxu0 %v612_v0  ;;  %568 = vmatprep.subr.mxu1 %v612_v0 }
  0x36   :  { %524 = vmatpush3.xpose.msk.msra.mxu0 %vm53_vm0, %v19_v30  ;;  %584 = vmatpush3.xpose.msk.msra.mxu1 %vm53_vm0, %v19_v30 }
  0x37   :  { %525 = vmatprep.subr.mxu0 %v612_v0  ;;  %569 = vmatprep.subr.mxu1 %v612_v0 }
  0x3a   :  { %526 = vmatpush3.xpose.msk.msra.mxu0 %vm53_vm0, %v18_v31  ;;  %585 = vmatpush3.xpose.msk.msra.mxu1 %vm53_vm0, %v18_v31 }
  0x3b   :  { %527 = vmatprep.subr.mxu0 %v612_v0  ;;  %570 = vmatprep.subr.mxu1 %v612_v0 }
  0x3e   :  { %528 = vmatpush3.xpose.msk.msra.mxu0 %vm53_vm0, %v17_v32  ;;  %586 = vmatpush3.xpose.msk.msra.mxu1 %vm53_vm0, %v17_v32  ;;  %v392_v32 = vshrl.u32 %v391_v28, 7 }
  0x41   :  { %530 = vmatmul.mubr.msk.f32.vlgmr.msra.gmra.mxu0 %vm53_vm0, %v48_v33  ;;  %539 = vmatmul.mubr.msk.f32.vlgmr.msra.gmra.mxu1 %vm53_vm0, %v51_v34 }
  0x42   :  { %532 = vmatprep.mubr.msk.f32.mxu0 %vm613_vm1, %v612_v0  ;;  %541 = vmatprep.mubr.msk.f32.mxu1 %vm613_vm1, %v612_v0 }
  0x45   :  { %533 = vmatmul.mubr.msk.f32.gmra.mxu0 %vm53_vm0, %v49_v35  ;;  %542 = vmatmul.mubr.msk.f32.gmra.mxu1 %vm53_vm0, %v52_v36 }
  0x46   :  { %535 = vmatprep.mubr.msk.f32.mxu0 %vm613_vm1, %v612_v0  ;;  %552 = vmatprep.mubr.msk.f32.mxu1 %vm267_vm2, %v255_v38  ;;  %v393_v38 = vsub.s32 0, %v392_v32 }
  0x49   :  { %536 = vmatmul.mubr.msk.f32.gmra.mxu0 %vm53_vm0, %v50_v37 }
  0x83   :  { %v215_v39 = vpop.permute.xlu1 %214  ;;  %v225_v40 = vpop.permute.xlu0 %224 }
  0x87   :  { %v210_v46 = vpop.permute.xlu1 %209  ;;  %v220_v55 = vpop.permute.xlu0 %219 }
  0x8b   :  { %v260_v10 = vpop.permute.xlu0 %259  ;;  %v265_v11 = vpop.permute.xlu1 %264 }
  0x8f   :  { %v354_v18 = vpop.permute.xlu0 %353  ;;  %v359_v19 = vpop.permute.xlu1 %358 }
  0x93   :  { %v373_v25 = vpop.permute.xlu0 %372  ;;  %v384_v35 = vpop.permute.xlu1 %383 }
  0x94   :  { %v376_v26 = vrot.slane %v373_v25, 1 }
  0x97   :  { %v389_v34 = vpop.permute.xlu0 %388 }
 0x101   :  { %v183_v41 = vpop.f32.mrf.mxu0  ;;  %v198_v42 = vpop.f32.mrf.mxu1 }
 0x102   :  { %v230_v43 = vadd.f32 %v225_v40, %v198_v42  ;;  %v227_v48 = vadd.f32 %v210_v46, %v183_v41  ;;  %v405_v41 = vpop.permute.xlu0 %404  ;;  %v400_v42 = vpop.permute.xlu1 %399 }
 0x103   :  { %v531_v44 = vpop.f32.mrf.mxu0  ;;  %v540_v45 = vpop.f32.mrf.mxu1 }
 0x104   :  { %v466_v47 = vmul.f32 -1.442695, %v230_v43  ;;  %v463_v56 = vmul.f32 -1.442695, %v227_v48 }
 0x105   :  { %v188_v49 = vpop.f32.mrf.mxu0  ;;  %v203_v50 = vpop.f32.mrf.mxu1 }
 0x106   :  { %v228_v51 = vadd.f32 %v215_v39, %v188_v49  ;;  %592 = vpow2.f32 %v466_v47  ;;  %v378_v30 = vadd.f32 %v376_v26, %v203_v50  ;;  %v419_v49 = vpop.permute.xlu0 %418  ;;  %v414_v50 = vpop.permute.xlu1 %413 }
 0x107   :  { %v534_v52 = vpop.f32.mrf.mxu0  ;;  %v543_v53 = vpop.f32.mrf.mxu1 }
 0x108   :  { %v464_v54 = vmul.f32 -1.442695, %v228_v51  ;;  %v379_v36 = vmax.f32 %v378_v30, 0.0 }
 0x109   :  { %v193_v57 = vpop.f32.mrf.mxu0 }
 0x10a   :  { %v229_v58 = vadd.f32 %v220_v55, %v193_v57  ;;  %594 = vpow2.f32 %v464_v54 }
 0x10b   :  { %v537_v59 = vpop.f32.mrf.mxu0  ;;  %596 = vpow2.f32 %v463_v56 }
 0x10c   :  { %v465_v60 = vmul.f32 -1.442695, %v229_v58 }
 0x10e   :  { %598 = vpow2.f32 %v465_v60 }
 0x113   :  { %v593_v61 = vpop.eup %592 }
 0x114   :  { %v246_v62 = vadd.f32 1.0, %v593_v61 }
 0x116   :  { %600 = vrcp.f32 %v246_v62 }
 0x117   :  { %v595_v63 = vpop.eup %594 }
 0x118   :  { %v597_v0 = vpop.eup %596  ;;  %v244_v2 = vadd.f32 1.0, %v595_v63 }
 0x119   :  { %v243_v4 = vadd.f32 1.0, %v597_v0 }
 0x11b   :  { %v599_v1 = vpop.eup %598 }
 0x11c   :  { %v245_v3 = vadd.f32 1.0, %v599_v1 }
 0x11e   :  { %602 = vrcp.f32 %v245_v3 }
 0x11f   :  { %604 = vrcp.f32 %v244_v2 }
 0x120   :  { %606 = vrcp.f32 %v243_v4 }
 0x123   :  { %v601_v5 = vpop.eup %600 }
 0x124   :  { %544 = vmatprep.subr.mxu1 %v601_v5 }
 0x125   :  { %545 = vmatpush3.msra.mxu1 %v601_v5 }
 0x12b   :  { %v603_v6 = vpop.eup %602 }
 0x12c   :  { %546 = vmatprep.subr.mxu1 %v603_v6  ;;  %v605_v7 = vpop.eup %604 }
 0x12d   :  { %547 = vmatpush3.msra.mxu1 %v603_v6  ;;  %v607_v8 = vpop.eup %606 }
 0x12e   :  { %548 = vmatprep.subr.mxu1 %v605_v7 }
 0x12f   :  { %549 = vmatpush3.msra.mxu1 %v605_v7 }
 0x130   :  { %550 = vmatprep.subr.mxu1 %v607_v8 }
 0x131   :  { %551 = vmatpush3.msra.mxu1 %v607_v8 }
 0x132   :  { %553 = vmatmul.mubr.msk.f32.vlgmr.msra.gmra.mxu1 %vm267_vm2, %v256_v9 }
 0x1f2   :  { %v554_v12 = vpop.f32.mrf.mxu1 }
 0x1f3   :  { %v346_v13 = vadd.f32 %v554_v12, %v265_v11 }
 0x1f4   :  { %v340_v14 = vpop.f32.mrf.mxu1 }
 0x1f5   :  { %v350_v15 = vmax.f32 %v346_v13, 0.0  ;;  %v341_v16 = vadd.f32 %v340_v14, %v260_v10 }
 0x1f7   :  { %v349_v17 = vmax.f32 %v341_v16, 0.0  ;;  %v362_v20 = vmul.f32 %v359_v19, %v350_v15 }
 0x1f9   :  { %v361_v21 = vmul.f32 %v354_v18, %v349_v17 }
 0x1fb   :  { %v363_v22 = vadd.f32 %v362_v20, %v361_v21 }
 0x1fd   :  { %v364_v23 = vrot.slane %v363_v22, 4 }
 0x1ff   :  { %v365_v24 = vadd.f32 %v364_v23, %v363_v22 }
 0x201   :  { %v366_v27 = vrot.slane %v365_v24, 2 }
 0x203   :  { %v367_v29 = vadd.f32 %v366_v27, %v365_v24 }
 0x205   :  { %v368_v31 = vrot.slane %v367_v29, 1 }
 0x207   :  { %v369_v33 = vadd.f32 %v368_v31, %v367_v29 }
 0x209   :  { %v375_v37 = vadd.f32 %v373_v25, %v369_v33 }
 0x20b   :  { %v380_v39 = vadd.f32 %v379_v36, %v375_v37 }
 0x20d   :  { %v394_v40 = vrot.slane %v380_v39, %v393_v38 }
 0x20f   :  { %v395_v43 = vmul.f32 %v394_v40, %v384_v35  ;;  %v396_v44 = vmul.f32 %v394_v40, %v389_v34 }
 0x211   :  { %v407_v45 = vadd.f32 %v400_v42, %v395_v43  ;;  %v408_v46 = vadd.f32 %v405_v41, %v396_v44 }
 0x213   :  { %v409_v47 = vmax.f32 %v407_v45, 0.0  ;;  %v410_v48 = vmax.f32 %v408_v46, 0.0 }
 0x215   :  { %v421_v51 = vmul.f32 %v414_v50, %v409_v47  ;;  %v422_v52 = vmul.f32 %v419_v49, %v410_v48 }
 0x217   :  { %v423_v53 = vadd.f32 %v422_v52, %v421_v51 }
 0x219   :  { %v424_v54 = vrot.slane %v423_v53, 4 }
 0x21b   :  { %v425_v55 = vadd.f32 %v424_v54, %v423_v53 }
 0x21d   :  { %v426_v56 = vrot.slane %v425_v55, 2 }
 0x21f   :  { %v427_v57 = vadd.f32 %v426_v56, %v425_v55 }
 0x221   :  { %v428_v58 = vrot.slane %v427_v57, 1 }
 0x223   :  { %v429_v59 = vadd.f32 %v428_v58, %v427_v57 }
 0x225   :  { %v430_v60 = vadd.f32 %v429_v59, %v373_v25 }
 0x227   :  { %v469_v61 = vmul.f32 -1.442695, %v430_v60 }
 0x229   :  { %608 = vpow2.f32 %v469_v61 }
 0x236   :  { %v609_v62 = vpop.eup %608 }
 0x237   :  { %v434_v63 = vadd.f32 1.0, %v609_v62 }
 0x239   :  { %610 = vrcp.f32 %v434_v63 }
 0x246   :  { %v611_v0 = vpop.eup %610 }
 0x247   :  { %437 = vst [vmem:[%s842_s4 - $0x2] sm:$0x4] %v611_v0 }

</bundles_post_ra>
